<compile_context>
chip_gen: v7x
topology: tpu7x:2x2x1
jax: 0.10.0
libtpu: 0.0.40
codegen_flags: <defaults>
</compile_context>

<pallas_src>
import functools
import math

import jax
import jax.numpy as jnp
from jax import lax
from jax.experimental import pallas as pl
from jax.experimental.pallas import tpu as pltpu

INV_SQRT2 = 0.7071067811865476


def _cdiv(a, b):
    return -(-a // b)


def _round_up(n, m):
    return _cdiv(n, m) * m


def _gelu_exact(x):
    # nn.GELU() default: exact erf-based GELU (computed in f32).
    return 0.5 * x * (1.0 + lax.erf(x * INV_SQRT2))


def _beam_kernel(f_in, out_widths, head2_cfg,
                 x_ref, w_ref, b_ref, w2_ref, b2_ref, out_ref):
    """Fused trunk (5x Linear+GELU) + fused head layer 1 + grouped block-diag head layer 2."""
    num_groups, g, gout, num_heads = head2_cfg

    h = x_ref[...].astype(jnp.bfloat16)        # (TB, F_pad) bf16
    in_rows = f_in
    off = 0
    for ow in out_widths:                      # 6 packed Linear+GELU layers
        z = jnp.dot(h, w_ref[0:in_rows, off:off + ow],
                    preferred_element_type=jnp.float32) + b_ref[:, off:off + ow]
        h = _gelu_exact(z).astype(jnp.bfloat16)
        off += ow
        in_rows = 128                          # all later layers take 128-wide (padded) input

    # h is now (TB, num_bs*128).  One matmul + dense 128-lane store per head group.
    for k in range(num_groups):
        heads_k = min(g, num_heads - k * g)
        rows = heads_k * 128
        hk = h[:, k * g * 128: k * g * 128 + rows]
        ok = jnp.dot(hk, w2_ref[k, 0:rows, :],
                     preferred_element_type=jnp.float32) + b2_ref[:, k * gout:(k + 1) * gout]
        out_ref[:, k * gout:(k + 1) * gout] = ok.astype(out_ref.dtype)


def pack_params(shared_params, head_params, feature_input_dim, num_bs, num_class):
    """Pack module parameters into the fused (bf16) buffers the kernel consumes."""
    hW1, hb1, hW2, hb2 = head_params
    f_pad = _round_up(feature_input_dim, 16)          # 16: bf16 sublane packing
    R = max(128, f_pad)
    out_widths = tuple([128] * 5 + [num_bs * 128])
    wcols = sum(out_widths)

    W_packed = jnp.zeros((R, wcols), jnp.float32)
    b_packed = jnp.zeros((1, wcols), jnp.float32)
    off = 0
    for (w, b) in shared_params:                      # 5 trunk layers, 128-wide column blocks
        in_d, out_d = w.shape
        W_packed = W_packed.at[:in_d, off:off + out_d].set(w)
        b_packed = b_packed.at[0, off:off + out_d].set(b)
        off += 128
    for j in range(num_bs):                           # fused head layer 1 (128 -> num_bs*128)
        W_packed = W_packed.at[:128, off + j * 128:off + (j + 1) * 128].set(hW1[j])
        b_packed = b_packed.at[0, off + j * 128:off + (j + 1) * 128].set(hb1[j, 0])

    # Grouped block-diagonal head layer 2: g heads per group fill (almost) 128 lanes.
    g = 1 if num_class >= 128 else min(num_bs, 128 // num_class)
    gout = _round_up(g * num_class, 128)
    num_groups = _cdiv(num_bs, g)
    W2 = jnp.zeros((num_groups, g * 128, gout), jnp.float32)
    b2 = jnp.zeros((1, num_groups * gout), jnp.float32)
    for j in range(num_bs):
        k, jl = j // g, j % g
        W2 = W2.at[k, jl * 128:(jl + 1) * 128,
                   jl * num_class:(jl + 1) * num_class].set(hW2[j])
        b2 = b2.at[0, k * gout + jl * num_class:
                      k * gout + (jl + 1) * num_class].set(hb2[j, 0])

    return {
        "W_packed": W_packed.astype(jnp.bfloat16),
        "b_packed": b_packed,
        "W2": W2.astype(jnp.bfloat16),
        "b2": b2,
        "R": R, "f_pad": f_pad, "out_widths": out_widths,
        "g": g, "gout": gout, "num_groups": num_groups,
        "num_bs": num_bs, "num_class": num_class,
    }


def _choose_batch_tile(B):
    """Batch tile: <= 512 rows, >= 2 grid steps once B > 256, minimal last-tile padding."""
    b16 = _round_up(B, 16)
    if b16 <= 256:
        return b16                         # single step; block equals full (padded) array
    max_tb = 512                           # VMEM cap (v5e 16 MiB scoped default, v7x 64 MiB)
    n_steps = max(2, _cdiv(b16, max_tb))   # >=2 steps -> pipelining + both v7x TCs
    return _round_up(_cdiv(b16, n_steps), 16)


def beam_prediction_forward(x, packed):
    """x: (B, F) float32.  Returns (B, num_bs, num_class) float32."""
    B, F = x.shape
    R = packed["R"]
    f_pad = packed["f_pad"]
    out_widths = packed["out_widths"]
    wcols = sum(out_widths)
    num_bs = packed["num_bs"]
    num_class = packed["num_class"]
    g, gout, num_groups = packed["g"], packed["gout"], packed["num_groups"]
    out_w = num_groups * gout

    TB = _choose_batch_tile(B)
    B_pad = _round_up(B, TB)
    grid = (B_pad // TB,)

    # Pad batch to the tile and features only to a multiple of 16 (NOT to 128).
    x_pad = jnp.pad(x, ((0, B_pad - B), (0, f_pad - F))).astype(jnp.bfloat16)

    in_specs = [
        pl.BlockSpec((TB, f_pad), lambda i: (i, 0)),                       # x tile
        pl.BlockSpec((R, wcols), lambda i: (0, 0),
                     pipeline_mode=pl.Buffered(1)),                        # packed trunk+head1 W
        pl.BlockSpec((1, wcols), lambda i: (0, 0),
                     pipeline_mode=pl.Buffered(1)),                        # packed biases
        pl.BlockSpec((num_groups, g * 128, gout), lambda i: (0, 0, 0),
                     pipeline_mode=pl.Buffered(1)),                        # grouped head2 W
        pl.BlockSpec((1, out_w), lambda i: (0, 0),
                     pipeline_mode=pl.Buffered(1)),                        # head2 bias
    ]
    out_spec = pl.BlockSpec((TB, out_w), lambda i: (i, 0))
    out_shape = jax.ShapeDtypeStruct((B_pad, out_w), jnp.float32)

    # Advisory cost estimate for the XLA scheduler.
    trunk_macs = f_pad * 128 + 4 * 128 * 128
    head1_macs = 128 * num_bs * 128
    head2_macs = num_bs * 128 * gout
    cost = pl.CostEstimate(
        flops=int(2 * B_pad * (trunk_macs + head1_macs + head2_macs)),
        transcendentals=int(B_pad * (5 * 128 + num_bs * 128)),
        bytes_accessed=int(x_pad.size * 2 + B_pad * out_w * 4
                           + R * wcols * 2 + wcols * 4
                           + num_groups * g * 128 * gout * 2 + out_w * 4),
    )

    # VMEM budget: double-buffered x/out, single-buffered weights, h intermediates.
    est_vmem = (2 * TB * f_pad * 2 + 2 * TB * out_w * 4
                + R * wcols * 2 + wcols * 4
                + num_groups * g * 128 * gout * 2 + out_w * 4
                + TB * num_bs * 128 * (4 + 2))
    vmem_limit = int(min(max(2 * est_vmem, 32 << 20), 64 << 20))

    kernel = functools.partial(
        _beam_kernel, f_pad, out_widths, (num_groups, g, gout, num_bs))
    out2d = pl.pallas_call(
        kernel,
        out_shape=out_shape,
        grid=grid,
        in_specs=in_specs,
        out_specs=out_spec,
        compiler_params=pltpu.CompilerParams(
            dimension_semantics=("parallel",),
            vmem_limit_bytes=vmem_limit,
        ),
        cost_estimate=cost,
    )(x_pad, packed["W_packed"], packed["b_packed"], packed["W2"], packed["b2"])

    # Free layout plumbing: drop padding, restore (B, num_bs, num_class).
    out3 = out2d[:B].reshape(B, num_groups, gout)[:, :, :g * num_class]
    return out3.reshape(B, num_groups * g, num_class)[:, :num_bs, :]


def _xavier_normal(key, fan_in, fan_out):
    std = math.sqrt(2.0 / (fan_in + fan_out))
    return std * jax.random.normal(key, (fan_in, fan_out), dtype=jnp.float32)


def init_params(key, feature_input_dim, num_bs, num_class):
    shared_dims = [feature_input_dim, 128, 64, 32, 64, 128]
    shared_params = []
    for i in range(len(shared_dims) - 1):
        key, sub = jax.random.split(key)
        w = _xavier_normal(sub, shared_dims[i], shared_dims[i + 1])
        b = jnp.zeros((shared_dims[i + 1],), dtype=jnp.float32)
        shared_params.append((w, b))

    hW1_list, hW2_list = [], []
    for _ in range(num_bs):
        key, s1, s2 = jax.random.split(key, 3)
        hW1_list.append(_xavier_normal(s1, 128, 128))
        hW2_list.append(_xavier_normal(s2, 128, num_class))
    hW1 = jnp.stack(hW1_list, axis=0)                      # (num_bs, 128, 128)
    hb1 = jnp.zeros((num_bs, 1, 128), dtype=jnp.float32)
    hW2 = jnp.stack(hW2_list, axis=0)                      # (num_bs, 128, C)
    hb2 = jnp.zeros((num_bs, 1, num_class), dtype=jnp.float32)
    return shared_params, (hW1, hb1, hW2, hb2)


def reference_forward(x, shared_params, head_params, num_bs):
    h = x
    for w, b in shared_params:
        h = jax.nn.gelu(h @ w + b, approximate=False)
    hW1, hb1, hW2, hb2 = head_params
    outs = []
    for j in range(num_bs):
        z = jax.nn.gelu(h @ hW1[j] + hb1[j][0], approximate=False)
        outs.append(z @ hW2[j] + hb2[j][0])
    return jnp.stack(outs, axis=-2)


if __name__ == "__main__":
    B = 8
    feature_input_dim = 32
    num_bs = 4
    num_class = 16

    key = jax.random.PRNGKey(0)
    key, pkey, xkey = jax.random.split(key, 3)
    shared_params, head_params = init_params(
        pkey, feature_input_dim, num_bs, num_class
    )
    x = jax.random.normal(xkey, (B, feature_input_dim), dtype=jnp.float32)

    packed = pack_params(
        shared_params, head_params, feature_input_dim, num_bs, num_class
    )
    out = beam_prediction_forward(x, packed)
    out = jax.block_until_ready(out)

    ref = reference_forward(x, shared_params, head_params, num_bs)
    assert out.shape == (B, num_bs, num_class)
    # Tolerance relaxed vs the f32 version: weights/activations are bf16 on the
    # MXU (f32 accumulation), per the performance review.
    assert jnp.allclose(out, ref, atol=2e-2, rtol=2e-2), float(
        jnp.max(jnp.abs(out - ref)))
    print("KERNEL_OK")
</pallas_src>

<mosaic_0001>
module attributes {stable_mosaic.version = 11 : i64} {
  func.func @_beam_kernel(%arg0: i32, %arg1: memref<16x32xbf16, #tpu.memory_space<vmem>>, %arg2: memref<128x1152xbf16, #tpu.memory_space<vmem>>, %arg3: memref<1x1152xf32, #tpu.memory_space<vmem>>, %arg4: memref<1x512x128xbf16, #tpu.memory_space<vmem>>, %arg5: memref<1x128xf32, #tpu.memory_space<vmem>>, %arg6: memref<16x128xf32, #tpu.memory_space<vmem>>) attributes {dimension_semantics = [#tpu.dimension_semantics<parallel>], iteration_bounds = array<i64: 1>, scalar_prefetch = 0 : i64, scratch_operands = 0 : i64, tpu.core_type = #tpu.core_type<tc>, window_params = [{transform_indices = @transform_0, window_bounds = array<i64: 16, 32>}, {pipeline_mode = #tpu.pipeline_mode<synchronous>, transform_indices = @transform_1, window_bounds = array<i64: 128, 1152>}, {pipeline_mode = #tpu.pipeline_mode<synchronous>, transform_indices = @transform_2, window_bounds = array<i64: 1, 1152>}, {pipeline_mode = #tpu.pipeline_mode<synchronous>, transform_indices = @transform_3, window_bounds = array<i64: 1, 512, 128>}, {pipeline_mode = #tpu.pipeline_mode<synchronous>, transform_indices = @transform_4, window_bounds = array<i64: 1, 128>}, {transform_indices = @transform_5, window_bounds = array<i64: 16, 128>}]} {
    %c0 = arith.constant 0 : index
    %c0_0 = arith.constant 0 : index
    %0 = vector.load %arg1[%c0, %c0_0] : memref<16x32xbf16, #tpu.memory_space<vmem>>, vector<16x32xbf16>
    %c0_1 = arith.constant 0 : index
    %c0_2 = arith.constant 0 : index
    %1 = vector.load %arg2[%c0_1, %c0_2] : memref<128x1152xbf16, #tpu.memory_space<vmem>>, vector<32x128xbf16>
    %cst = arith.constant dense<0.000000e+00> : vector<16x128xf32>
    %2 = tpu.matmul %0, %1, %cst {dimension_numbers = #tpu.dot_dimension_numbers<[1], [0], [0], [1], [0, 0, 1, 1], [], []>} : vector<16x32xbf16>, vector<32x128xbf16>, vector<16x128xf32> -> vector<16x128xf32>
    %c0_3 = arith.constant 0 : index
    %c0_4 = arith.constant 0 : index
    %3 = vector.load %arg3[%c0_3, %c0_4] : memref<1x1152xf32, #tpu.memory_space<vmem>>, vector<1x128xf32>
    %4 = vector.broadcast %3 : vector<1x128xf32> to vector<16x128xf32>
    %5 = arith.addf %2, %4 : vector<16x128xf32>
    %cst_5 = arith.constant 5.000000e-01 : f32
    %6 = vector.broadcast %cst_5 : f32 to vector<16x128xf32>
    %7 = arith.mulf %6, %5 : vector<16x128xf32>
    %cst_6 = arith.constant 0.707106769 : f32
    %8 = vector.broadcast %cst_6 : f32 to vector<16x128xf32>
    %9 = arith.mulf %5, %8 : vector<16x128xf32>
    %10 = math.erf %9 : vector<16x128xf32>
    %cst_7 = arith.constant 1.000000e+00 : f32
    %11 = vector.broadcast %cst_7 : f32 to vector<16x128xf32>
    %12 = arith.addf %11, %10 : vector<16x128xf32>
    %13 = arith.mulf %7, %12 : vector<16x128xf32>
    %14 = arith.truncf %13 : vector<16x128xf32> to vector<16x128xbf16>
    %c0_8 = arith.constant 0 : index
    %c128 = arith.constant 128 : index
    %15 = vector.load %arg2[%c0_8, %c128] : memref<128x1152xbf16, #tpu.memory_space<vmem>>, vector<128x128xbf16>
    %cst_9 = arith.constant dense<0.000000e+00> : vector<16x128xf32>
    %16 = tpu.matmul %14, %15, %cst_9 {dimension_numbers = #tpu.dot_dimension_numbers<[1], [0], [0], [1], [0, 0, 1, 1], [], []>} : vector<16x128xbf16>, vector<128x128xbf16>, vector<16x128xf32> -> vector<16x128xf32>
    %c0_10 = arith.constant 0 : index
    %c128_11 = arith.constant 128 : index
    %17 = vector.load %arg3[%c0_10, %c128_11] : memref<1x1152xf32, #tpu.memory_space<vmem>>, vector<1x128xf32>
    %18 = vector.broadcast %17 : vector<1x128xf32> to vector<16x128xf32>
    %19 = arith.addf %16, %18 : vector<16x128xf32>
    %cst_12 = arith.constant 5.000000e-01 : f32
    %20 = vector.broadcast %cst_12 : f32 to vector<16x128xf32>
    %21 = arith.mulf %20, %19 : vector<16x128xf32>
    %cst_13 = arith.constant 0.707106769 : f32
    %22 = vector.broadcast %cst_13 : f32 to vector<16x128xf32>
    %23 = arith.mulf %19, %22 : vector<16x128xf32>
    %24 = math.erf %23 : vector<16x128xf32>
    %cst_14 = arith.constant 1.000000e+00 : f32
    %25 = vector.broadcast %cst_14 : f32 to vector<16x128xf32>
    %26 = arith.addf %25, %24 : vector<16x128xf32>
    %27 = arith.mulf %21, %26 : vector<16x128xf32>
    %28 = arith.truncf %27 : vector<16x128xf32> to vector<16x128xbf16>
    %c0_15 = arith.constant 0 : index
    %c256 = arith.constant 256 : index
    %29 = vector.load %arg2[%c0_15, %c256] : memref<128x1152xbf16, #tpu.memory_space<vmem>>, vector<128x128xbf16>
    %cst_16 = arith.constant dense<0.000000e+00> : vector<16x128xf32>
    %30 = tpu.matmul %28, %29, %cst_16 {dimension_numbers = #tpu.dot_dimension_numbers<[1], [0], [0], [1], [0, 0, 1, 1], [], []>} : vector<16x128xbf16>, vector<128x128xbf16>, vector<16x128xf32> -> vector<16x128xf32>
    %c0_17 = arith.constant 0 : index
    %c256_18 = arith.constant 256 : index
    %31 = vector.load %arg3[%c0_17, %c256_18] : memref<1x1152xf32, #tpu.memory_space<vmem>>, vector<1x128xf32>
    %32 = vector.broadcast %31 : vector<1x128xf32> to vector<16x128xf32>
    %33 = arith.addf %30, %32 : vector<16x128xf32>
    %cst_19 = arith.constant 5.000000e-01 : f32
    %34 = vector.broadcast %cst_19 : f32 to vector<16x128xf32>
    %35 = arith.mulf %34, %33 : vector<16x128xf32>
    %cst_20 = arith.constant 0.707106769 : f32
    %36 = vector.broadcast %cst_20 : f32 to vector<16x128xf32>
    %37 = arith.mulf %33, %36 : vector<16x128xf32>
    %38 = math.erf %37 : vector<16x128xf32>
    %cst_21 = arith.constant 1.000000e+00 : f32
    %39 = vector.broadcast %cst_21 : f32 to vector<16x128xf32>
    %40 = arith.addf %39, %38 : vector<16x128xf32>
    %41 = arith.mulf %35, %40 : vector<16x128xf32>
    %42 = arith.truncf %41 : vector<16x128xf32> to vector<16x128xbf16>
    %c0_22 = arith.constant 0 : index
    %c384 = arith.constant 384 : index
    %43 = vector.load %arg2[%c0_22, %c384] : memref<128x1152xbf16, #tpu.memory_space<vmem>>, vector<128x128xbf16>
    %cst_23 = arith.constant dense<0.000000e+00> : vector<16x128xf32>
    %44 = tpu.matmul %42, %43, %cst_23 {dimension_numbers = #tpu.dot_dimension_numbers<[1], [0], [0], [1], [0, 0, 1, 1], [], []>} : vector<16x128xbf16>, vector<128x128xbf16>, vector<16x128xf32> -> vector<16x128xf32>
    %c0_24 = arith.constant 0 : index
    %c384_25 = arith.constant 384 : index
    %45 = vector.load %arg3[%c0_24, %c384_25] : memref<1x1152xf32, #tpu.memory_space<vmem>>, vector<1x128xf32>
    %46 = vector.broadcast %45 : vector<1x128xf32> to vector<16x128xf32>
    %47 = arith.addf %44, %46 : vector<16x128xf32>
    %cst_26 = arith.constant 5.000000e-01 : f32
    %48 = vector.broadcast %cst_26 : f32 to vector<16x128xf32>
    %49 = arith.mulf %48, %47 : vector<16x128xf32>
    %cst_27 = arith.constant 0.707106769 : f32
    %50 = vector.broadcast %cst_27 : f32 to vector<16x128xf32>
    %51 = arith.mulf %47, %50 : vector<16x128xf32>
    %52 = math.erf %51 : vector<16x128xf32>
    %cst_28 = arith.constant 1.000000e+00 : f32
    %53 = vector.broadcast %cst_28 : f32 to vector<16x128xf32>
    %54 = arith.addf %53, %52 : vector<16x128xf32>
    %55 = arith.mulf %49, %54 : vector<16x128xf32>
    %56 = arith.truncf %55 : vector<16x128xf32> to vector<16x128xbf16>
    %c0_29 = arith.constant 0 : index
    %c512 = arith.constant 512 : index
    %57 = vector.load %arg2[%c0_29, %c512] : memref<128x1152xbf16, #tpu.memory_space<vmem>>, vector<128x128xbf16>
    %cst_30 = arith.constant dense<0.000000e+00> : vector<16x128xf32>
    %58 = tpu.matmul %56, %57, %cst_30 {dimension_numbers = #tpu.dot_dimension_numbers<[1], [0], [0], [1], [0, 0, 1, 1], [], []>} : vector<16x128xbf16>, vector<128x128xbf16>, vector<16x128xf32> -> vector<16x128xf32>
    %c0_31 = arith.constant 0 : index
    %c512_32 = arith.constant 512 : index
    %59 = vector.load %arg3[%c0_31, %c512_32] : memref<1x1152xf32, #tpu.memory_space<vmem>>, vector<1x128xf32>
    %60 = vector.broadcast %59 : vector<1x128xf32> to vector<16x128xf32>
    %61 = arith.addf %58, %60 : vector<16x128xf32>
    %cst_33 = arith.constant 5.000000e-01 : f32
    %62 = vector.broadcast %cst_33 : f32 to vector<16x128xf32>
    %63 = arith.mulf %62, %61 : vector<16x128xf32>
    %cst_34 = arith.constant 0.707106769 : f32
    %64 = vector.broadcast %cst_34 : f32 to vector<16x128xf32>
    %65 = arith.mulf %61, %64 : vector<16x128xf32>
    %66 = math.erf %65 : vector<16x128xf32>
    %cst_35 = arith.constant 1.000000e+00 : f32
    %67 = vector.broadcast %cst_35 : f32 to vector<16x128xf32>
    %68 = arith.addf %67, %66 : vector<16x128xf32>
    %69 = arith.mulf %63, %68 : vector<16x128xf32>
    %70 = arith.truncf %69 : vector<16x128xf32> to vector<16x128xbf16>
    %c0_36 = arith.constant 0 : index
    %c640 = arith.constant 640 : index
    %71 = vector.load %arg2[%c0_36, %c640] : memref<128x1152xbf16, #tpu.memory_space<vmem>>, vector<128x512xbf16>
    %cst_37 = arith.constant dense<0.000000e+00> : vector<16x512xf32>
    %72 = tpu.matmul %70, %71, %cst_37 {dimension_numbers = #tpu.dot_dimension_numbers<[1], [0], [0], [1], [0, 0, 1, 1], [], []>} : vector<16x128xbf16>, vector<128x512xbf16>, vector<16x512xf32> -> vector<16x512xf32>
    %c0_38 = arith.constant 0 : index
    %c640_39 = arith.constant 640 : index
    %73 = vector.load %arg3[%c0_38, %c640_39] : memref<1x1152xf32, #tpu.memory_space<vmem>>, vector<1x512xf32>
    %74 = vector.broadcast %73 : vector<1x512xf32> to vector<16x512xf32>
    %75 = arith.addf %72, %74 : vector<16x512xf32>
    %cst_40 = arith.constant 5.000000e-01 : f32
    %76 = vector.broadcast %cst_40 : f32 to vector<16x512xf32>
    %77 = arith.mulf %76, %75 : vector<16x512xf32>
    %cst_41 = arith.constant 0.707106769 : f32
    %78 = vector.broadcast %cst_41 : f32 to vector<16x512xf32>
    %79 = arith.mulf %75, %78 : vector<16x512xf32>
    %80 = math.erf %79 : vector<16x512xf32>
    %cst_42 = arith.constant 1.000000e+00 : f32
    %81 = vector.broadcast %cst_42 : f32 to vector<16x512xf32>
    %82 = arith.addf %81, %80 : vector<16x512xf32>
    %83 = arith.mulf %77, %82 : vector<16x512xf32>
    %84 = arith.truncf %83 : vector<16x512xf32> to vector<16x512xbf16>
    %c0_43 = arith.constant 0 : index
    %c0_44 = arith.constant 0 : index
    %c0_45 = arith.constant 0 : index
    %85 = vector.load %arg4[%c0_43, %c0_44, %c0_45] : memref<1x512x128xbf16, #tpu.memory_space<vmem>>, vector<1x512x128xbf16>
    %86 = vector.shape_cast %85 : vector<1x512x128xbf16> to vector<512x128xbf16>
    %cst_46 = arith.constant dense<0.000000e+00> : vector<16x128xf32>
    %87 = tpu.matmul %84, %86, %cst_46 {dimension_numbers = #tpu.dot_dimension_numbers<[1], [0], [0], [1], [0, 0, 1, 1], [], []>} : vector<16x512xbf16>, vector<512x128xbf16>, vector<16x128xf32> -> vector<16x128xf32>
    %c0_47 = arith.constant 0 : index
    %c0_48 = arith.constant 0 : index
    %88 = vector.load %arg5[%c0_47, %c0_48] : memref<1x128xf32, #tpu.memory_space<vmem>>, vector<1x128xf32>
    %89 = vector.broadcast %88 : vector<1x128xf32> to vector<16x128xf32>
    %90 = arith.addf %87, %89 : vector<16x128xf32>
    %c0_49 = arith.constant 0 : index
    %c0_50 = arith.constant 0 : index
    %91 = vector.load %arg6[%c0_49, %c0_50] : memref<16x128xf32, #tpu.memory_space<vmem>>, vector<16x128xf32>
    tpu.vector_store %arg6[%c0_49, %c0_50], %90 {strides = array<i32>} : memref<16x128xf32, #tpu.memory_space<vmem>>, vector<16x128xf32>,
    return
  }
  func.func @transform_0(%arg0: i32) -> (i32, i32) {
    %c0_i32 = arith.constant 0 : i32
    %c0_i32_0 = arith.constant 0 : i32
    return %arg0, %c0_i32 : i32, i32
  }
  func.func @transform_1(%arg0: i32) -> (i32, i32) {
    %c0_i32 = arith.constant 0 : i32
    %c0_i32_0 = arith.constant 0 : i32
    %c0_i32_1 = arith.constant 0 : i32
    return %c0_i32, %c0_i32_0 : i32, i32
  }
  func.func @transform_2(%arg0: i32) -> (i32, i32) {
    %c0_i32 = arith.constant 0 : i32
    %c0_i32_0 = arith.constant 0 : i32
    %c0_i32_1 = arith.constant 0 : i32
    return %c0_i32, %c0_i32_0 : i32, i32
  }
  func.func @transform_3(%arg0: i32) -> (i32, i32, i32) {
    %c0_i32 = arith.constant 0 : i32
    %c0_i32_0 = arith.constant 0 : i32
    %c0_i32_1 = arith.constant 0 : i32
    %c0_i32_2 = arith.constant 0 : i32
    return %c0_i32, %c0_i32_0, %c0_i32_1 : i32, i32, i32
  }
  func.func @transform_4(%arg0: i32) -> (i32, i32) {
    %c0_i32 = arith.constant 0 : i32
    %c0_i32_0 = arith.constant 0 : i32
    %c0_i32_1 = arith.constant 0 : i32
    return %c0_i32, %c0_i32_0 : i32, i32
  }
  func.func @transform_5(%arg0: i32) -> (i32, i32) {
    %c0_i32 = arith.constant 0 : i32
    %c0_i32_0 = arith.constant 0 : i32
    return %arg0, %c0_i32 : i32, i32
  }
}

</mosaic_0001>

<bundles_post_ra>
// kernel: tpu_custom_call.1
= control target key start
LH: loop header
LB: loop body
LE: loop exit
PB: predicated region body
PF: predicated region fallthrough
CT: control target
= control target key end

     0   :  { %10 = vsyncpa [#allocation3], 0  ;;  %s2087_s0 = inlined_call_operand.hbm [shape: bf16[16,32], index: 0, kind: input, shape index: {}]   ;;  %s2088_s1 = inlined_call_operand.hbm [shape: bf16[128,1152], index: 1, kind: input, shape index: {}]   ;;  %s2089_s2 = inlined_call_operand.hbm [shape: f32[1,1152], index: 2, kind: input, shape index: {}]   ;;  %s2090_s3 = inlined_call_operand.hbm [shape: bf16[1,512,128], index: 3, kind: input, shape index: {}]   ;;  %s2091_s4 = inlined_call_operand.vmem [shape: f32[1,128], index: 4, kind: input, shape index: {}]   ;;  %s2092_s5 = inlined_call_operand.hbm [shape: f32[16,128], index: 5, kind: output, shape index: {}]  }
   0x1   :  { %11 = vsyncpa [#allocation6], 0 }
   0x2   :  { %12 = vsyncpa [#allocation9], 0 }
   0x3   :  { %13 = vsyncpa [#allocation4], 0  ;;  %s1923_s18 = smov [#allocation5]   ;;  %s1805_s22 = scalar_lea.hbm %s2088_s1, 9216 }
   0x4   :  { %s31_s19 = sshll.u32 %s1923_s18, 4  ;;  %p1806_p0 = scmp.ne.s32.totalorder %s2088_s1, %s1805_s22  ;;  %s32_s19 = int_to_ptr.vmem [resolvable:$true] %s31_s19 }
   0x5   :  { %p1809_p1 = scmp.lt.u32.totalorder %s1805_s22, %s2088_s1 }
   0x7   :  { %p1811_p2 = pnand %p1809_p1, %p1806_p0 }
   0x9   :  { %1814 = shalt.err (!%p1811_p2)
}
   0xa   :  { %s1815_s27 = scalar_lea.vmem %s32_s19, 9216  ;;  %p1820_p4 = scmp.lt.s32.totalorder %s32_s19, %s32_s19 }
   0xb   :  { %p1816_p3 = scmp.ne.s32.totalorder %s32_s19, %s1815_s27  ;;  %p1821_p5 = scmp.lt.s32.totalorder %s1815_s27, %s1815_s27 }
   0xd   :  { %p1822_p6 = por %p1821_p5, %p1820_p4 }
   0xf   :  { %p1823_p7 = pnand %p1822_p6, %p1816_p3 }
  0x11   :  { %1826 = shalt.err (!%p1823_p7)
}
  0x12   :  { %s1924_s28 = smov 576   ;;  %s1925_s29 = smov 36  }
  0x13   :  { %37 = dma.hbm_to_vmem [thread:$0]  %s2088_s1, 9216, %s32_s19, [#allocation6], %s1924_s28, %s1924_s28, %s1925_s29  }
  0x14   :  { %s1926_s7 = smov [#allocation2]   ;;  %s1827_s11 = scalar_lea.hbm %s2087_s0, 128 }
  0x15   :  { %s19_s8 = sshll.u32 %s1926_s7, 4  ;;  %p1828_p8 = scmp.ne.s32.totalorder %s2087_s0, %s1827_s11  ;;  %s20_s8 = int_to_ptr.vmem [resolvable:$true] %s19_s8 }
  0x16   :  { %p1831_p9 = scmp.lt.u32.totalorder %s1827_s11, %s2087_s0 }
  0x18   :  { %p1833_p10 = pnand %p1831_p9, %p1828_p8 }
  0x1a   :  { %1836 = shalt.err (!%p1833_p10)
}
  0x1b   :  { %s1837_s16 = scalar_lea.vmem %s20_s8, 128  ;;  %p1842_p12 = scmp.lt.s32.totalorder %s20_s8, %s20_s8 }
  0x1c   :  { %p1838_p11 = scmp.ne.s32.totalorder %s20_s8, %s1837_s16  ;;  %p1843_p13 = scmp.lt.s32.totalorder %s1837_s16, %s1837_s16 }
  0x1e   :  { %p1844_p0 = por %p1843_p13, %p1842_p12 }
  0x20   :  { %p1845_p1 = pnand %p1844_p0, %p1838_p11 }
  0x22   :  { %1848 = shalt.err (!%p1845_p1)
}
  0x23   :  { %s1927_s1 = smov 64   ;;  %s1928_s17 = smov 4  }
  0x24   :  { %25 = dma.hbm_to_vmem [thread:$0]  %s2087_s0, 128, %s20_s8, [#allocation3], %s1927_s1, %s1927_s1, %s1928_s17  }
  0x25   :  { %s1929_s20 = smov [#allocation7]   ;;  %s1930_s22 = smov [#allocation8]  }
  0x26   :  { %s44_s21 = sshll.u32 %s1929_s20, 4  ;;  %s53_s23 = sshll.u32 %s1930_s22, 4  ;;  %s45_s21 = int_to_ptr.vmem [resolvable:$true] %s44_s21  ;;  %s1994_s23 = int_to_ptr.vmem [resolvable:$true] %s53_s23 }
  0x27   :  { %s1849_s26 = scalar_lea.hbm %s2089_s2, 144 }
  0x28   :  { %p1850_p2 = scmp.ne.s32.totalorder %s2089_s2, %s1849_s26  ;;  %p1853_p3 = scmp.lt.u32.totalorder %s1849_s26, %s2089_s2 }
  0x2a   :  { %p1855_p4 = pnand %p1853_p3, %p1850_p2 }
  0x2c   :  { %1858 = shalt.err (!%p1855_p4)
}
  0x2d   :  { %s1859_s0 = scalar_lea.vmem %s45_s21, 144  ;;  %s1863_s6 = scalar_lea.vmem %s45_s21, 160 }
  0x2e   :  { %p1860_p5 = scmp.ne.s32.totalorder %s45_s21, %s1859_s0  ;;  %p1864_p6 = scmp.lt.s32.totalorder %s45_s21, %s45_s21 }
  0x2f   :  { %p1865_p7 = scmp.lt.s32.totalorder %s1863_s6, %s1859_s0 }
  0x31   :  { %p1866_p8 = por %p1865_p7, %p1864_p6 }
  0x33   :  { %p1867_p9 = pnand %p1866_p8, %p1860_p5 }
  0x35   :  { %1870 = shalt.err (!%p1867_p9)
}
  0x36   :  { %47 = dma.hbm_to_vmem [thread:$0]  %s2089_s2, 144, %s45_s21, [#allocation6]  }
  0x37   :  { %s1871_s11 = scalar_lea.hbm %s2090_s3, 4096 }
  0x38   :  { %p1872_p10 = scmp.ne.s32.totalorder %s2090_s3, %s1871_s11  ;;  %p1875_p11 = scmp.lt.u32.totalorder %s1871_s11, %s2090_s3 }
  0x3a   :  { %p1877_p12 = pnand %p1875_p11, %p1872_p10 }
  0x3c   :  { %1880 = shalt.err (!%p1877_p12)
}
  0x3d   :  { %s1881_s16 = scalar_lea.vmem %s1994_s23, 4096  ;;  %p1886_p0 = scmp.lt.s32.totalorder %s1994_s23, %s1994_s23 }
  0x3e   :  { %p1882_p13 = scmp.ne.s32.totalorder %s1994_s23, %s1881_s16  ;;  %p1887_p1 = scmp.lt.s32.totalorder %s1881_s16, %s1881_s16 }
  0x40   :  { %p1888_p2 = por %p1887_p1, %p1886_p0 }
  0x42   :  { %p1889_p3 = pnand %p1888_p2, %p1882_p13 }
  0x44   :  { %1892 = shalt.err (!%p1889_p3)
}
  0x45   :  { %59 = dma.hbm_to_vmem [thread:$0]  %s2090_s3, 4096, %s1994_s23, [#allocation9], %s1927_s1, %s1927_s1, %s1928_s17  }
  0x46   :  { %1915 = dma.done.wait [#allocation3], 128  }
  0x47   :  { %1916 = vsyncadd [#allocation3], 4294967168 }
  0x48   :  { %1917 = dma.done.wait [#allocation6], 9360  }
  0x49   :  { %1918 = vsyncadd [#allocation6], 4294957936 }
  0x4a   :  { %1919 = dma.done.wait [#allocation9], 4096  }
  0x4b   :  { %1920 = vsyncadd [#allocation9], 4294963200  ;;  %v1931_v0 = vmov 0.0   ;;  %vm1932_vm0 = vmmov 0   ;;  %v1654_v1 = vld [vmem:[#allocation5] ss:$36 sps:$4 sm:$0xff]  }
  0x4c   :  { %1552 = vmatprep.subr.bf16.mxu0 %v1931_v0  ;;  %1556 = vmatprep.mubr.msk.bf16.mxu0 %vm1932_vm0, %v1931_v0  ;;  %v1655_v2 = vld [vmem:[#allocation5 + $0x48] ss:$36 sps:$4 sm:$0xff]   ;;  %v1656_v4 = vld [vmem:[#allocation2] sm:$0xff]   ;;  %vm105_vm1 = vcmask 261120   ;;  %v1666_v13 = vld [vmem:[#allocation5 + $0x50] ss:$36 sps:$4 sm:$0xff]  }
  0x4d   :  { %1560 = vmatprep.subr.bf16.mxu1 %v1931_v0  ;;  %1576 = vmatprep.mubr.msk.bf16.mxu1 %vm1932_vm0, %v1931_v0  ;;  %v1657_v3 = vld [vmem:[#allocation5 + $0x4] ss:$36 sps:$4 sm:$0xff]   ;;  %v1658_v5 = vld [vmem:[#allocation5 + $0x4c] ss:$36 sps:$4 sm:$0xff]   ;;  %v1659_v6 = vld [vmem:[#allocation5 + $0x94] ss:$36 sps:$4 sm:$0xff]  }
  0x4e   :  { %1553 = vmatpush3.bf16.msra.mxu0 %v1654_v1  ;;  %1561 = vmatpush3.bf16.msra.mxu1 %v1657_v3  ;;  %v1660_v7 = vld [vmem:[#allocation5 + $0xdc] ss:$36 sps:$4 sm:$0xff]   ;;  %v1661_v8 = vld [vmem:[#allocation5 + $0x124] ss:$36 sps:$4 sm:$0xff]   ;;  %v1662_v9 = vld [vmem:[#allocation5 + $0x16c] ss:$36 sps:$4 sm:$0xff]  }
  0x4f   :  { %1554 = vmatprep.subr.bf16.mxu0 %v1931_v0  ;;  %1562 = vmatprep.subr.bf16.mxu1 %v1931_v0  ;;  %v1663_v10 = vld [vmem:[#allocation5 + $0x1b4] ss:$36 sps:$4 sm:$0xff]   ;;  %v1664_v11 = vld [vmem:[#allocation5 + $0x1fc] ss:$36 sps:$4 sm:$0xff]   ;;  %v1665_v12 = vld [vmem:[#allocation5 + $0x8] ss:$36 sps:$4 sm:$0xff]  }
  0x50   :  { %v1363_v14 = vld [vmem:[#allocation7] ss:$0 sm:$0xff]  ;;  %v1667_v32 = vld [vmem:[#allocation5 + $0x98] ss:$36 sps:$4 sm:$0xff]   ;;  %v1669_v34 = vld [vmem:[#allocation5 + $0x128] ss:$36 sps:$4 sm:$0xff]  }
  0x51   :  { %v1668_v33 = vld [vmem:[#allocation5 + $0xe0] ss:$36 sps:$4 sm:$0xff]   ;;  %v1670_v35 = vld [vmem:[#allocation5 + $0x170] ss:$36 sps:$4 sm:$0xff]   ;;  %v1671_v36 = vld [vmem:[#allocation5 + $0x1b8] ss:$36 sps:$4 sm:$0xff]  }
  0x52   :  { %1555 = vmatpush3.bf16.msra.mxu0 %v1655_v2  ;;  %1563 = vmatpush3.bf16.msra.mxu1 %v1658_v5  ;;  %v1672_v37 = vld [vmem:[#allocation5 + $0x200] ss:$36 sps:$4 sm:$0xff]   ;;  %v1673_v38 = vld [vmem:[#allocation5 + $0xc] ss:$36 sps:$4 sm:$0xff]   ;;  %v1674_v39 = vld [vmem:[#allocation5 + $0x54] ss:$36 sps:$4 sm:$0xff]  }
  0x53   :  { %1580 = vmatprep.subr.bf16.mxu0 %v1931_v0  ;;  %1564 = vmatprep.subr.bf16.mxu1 %v1931_v0  ;;  %v1368_v40 = vld [vmem:[#allocation7 + $0x1] ss:$0 sm:$0xff]  ;;  %v1676_v59 = vld [vmem:[#allocation5 + $0xe4] ss:$36 sps:$4 sm:$0xff]   ;;  %v1677_v60 = vld [vmem:[#allocation5 + $0x12c] ss:$36 sps:$4 sm:$0xff]  }
  0x54   :  { %v1675_v58 = vld [vmem:[#allocation5 + $0x9c] ss:$36 sps:$4 sm:$0xff]   ;;  %v1678_v61 = vld [vmem:[#allocation5 + $0x174] ss:$36 sps:$4 sm:$0xff]   ;;  %v1680_v63 = vld [vmem:[#allocation5 + $0x204] ss:$36 sps:$4 sm:$0xff]  }
  0x55   :  { %1557 = vmatmul.mubr.msk.bf16.vlgmr.msra.gmra.mrb[0].mxu0 %vm105_vm1, %v1656_v4  ;;  %v1679_v62 = vld [vmem:[#allocation5 + $0x1bc] ss:$36 sps:$4 sm:$0xff]   ;;  %v1681_v1 = vld [vmem:[#allocation5 + $0x10] ss:$36 sps:$4 sm:$0xff]   ;;  %s1934_s17 = smov [#allocation10]  }
  0x56   :  { %1596 = vmatprep.mubr.msk.bf16.mxu0 %vm1932_vm0, %v1931_v0  ;;  %1565 = vmatpush3.bf16.msra.mxu1 %v1659_v6  ;;  %v1682_v2 = vld [vmem:[#allocation5 + $0x58] ss:$36 sps:$4 sm:$0xff]   ;;  %v1377_v3 = vld [vmem:[#allocation7 + $0x2] ss:$0 sm:$0xff]  ;;  %s1349_s19 = sshll.u32 %s1934_s17, 4  ;;  %s1350_s19 = int_to_ptr.vmem [resolvable:$true] %s1349_s19 }
  0x57   :  { %1566 = vmatprep.subr.bf16.mxu1 %v1931_v0  ;;  %1581 = vmatpush3.bf16.msra.mxu0 %v1665_v12  ;;  %p1898_p5 = scmp.lt.s32.totalorder %s1350_s19, %s1350_s19 }
  0x58   :  { %1582 = vmatprep.subr.bf16.mxu0 %v1931_v0 }
  0x5a   :  { %1567 = vmatpush3.bf16.msra.mxu1 %v1660_v7 }
  0x5b   :  { %1568 = vmatprep.subr.bf16.mxu1 %v1931_v0  ;;  %1583 = vmatpush3.bf16.msra.mxu0 %v1666_v13 }
  0x5c   :  { %1584 = vmatprep.subr.bf16.mxu0 %v1931_v0 }
  0x5e   :  { %1569 = vmatpush3.bf16.msra.mxu1 %v1661_v8 }
  0x5f   :  { %1570 = vmatprep.subr.bf16.mxu1 %v1931_v0  ;;  %1585 = vmatpush3.bf16.msra.mxu0 %v1667_v32  ;;  %v1386_v32 = vld [vmem:[#allocation7 + $0x3] ss:$0 sm:$0xff] }
  0x60   :  { %1586 = vmatprep.subr.bf16.mxu0 %v1931_v0 }
  0x62   :  { %1571 = vmatpush3.bf16.msra.mxu1 %v1662_v9 }
  0x63   :  { %1572 = vmatprep.subr.bf16.mxu1 %v1931_v0  ;;  %1587 = vmatpush3.bf16.msra.mxu0 %v1668_v33 }
  0x64   :  { %1588 = vmatprep.subr.bf16.mxu0 %v1931_v0 }
  0x66   :  { %1573 = vmatpush3.bf16.msra.mxu1 %v1663_v10 }
  0x67   :  { %1574 = vmatprep.subr.bf16.mxu1 %v1931_v0  ;;  %1589 = vmatpush3.bf16.msra.mxu0 %v1669_v34 }
  0x68   :  { %1590 = vmatprep.subr.bf16.mxu0 %v1931_v0 }
  0x6a   :  { %1575 = vmatpush3.bf16.msra.mxu1 %v1664_v11 }
  0x6b   :  { %1600 = vmatprep.subr.bf16.mxu1 %v1931_v0  ;;  %1591 = vmatpush3.bf16.msra.mxu0 %v1670_v35 }
  0x6c   :  { %1592 = vmatprep.subr.bf16.mxu0 %v1931_v0 }
  0x6f   :  { %1593 = vmatpush3.bf16.msra.mxu0 %v1671_v36 }
  0x70   :  { %1594 = vmatprep.subr.bf16.mxu0 %v1931_v0 }
  0x73   :  { %1595 = vmatpush3.bf16.msra.mxu0 %v1672_v37 }
  0x74   :  { %1620 = vmatprep.subr.bf16.mxu0 %v1931_v0 }
 0x128   :  { %v143_v15 = vpop.f32.mrb[0].mxu0 }
 0x129   :  { %v144_v16 = vadd.f32 %v1363_v14, %v143_v15  ;;  %v1558_v17 = vpop.f32.mrb[1].mxu0 }
 0x12a   :  { %v146_v18 = vpop.f32.mrb[2].mxu0 }
 0x12b   :  { %v152_v19 = vmul.f32 0.70710677, %v144_v16  ;;  %v147_v20 = vadd.f32 %v1363_v14, %v146_v18  ;;  %v1559_v21 = vpop.f32.mrb[3].mxu0  ;;  %v150_v26 = vmul.f32 0.5, %v144_v16 }
 0x12c   :  { %v1683_v21 = vld [vmem:[#allocation5 + $0xa0] ss:$36 sps:$4 sm:$0xff]  }
 0x12d   :  { %1769 = verf.f32 %v152_v19  ;;  %v153_v22 = vmul.f32 0.70710677, %v147_v20  ;;  %v151_v27 = vmul.f32 0.5, %v147_v20 }
 0x12f   :  { %1771 = verf.f32 %v153_v22  ;;  %v1684_v22 = vld [vmem:[#allocation5 + $0xe8] ss:$36 sps:$4 sm:$0xff]  }
 0x137   :  { %v1770_v23 = vpop.eup %1769 }
 0x138   :  { %v156_v24 = vadd.f32 1.0, %v1770_v23  ;;  %v1685_v23 = vld [vmem:[#allocation5 + $0x130] ss:$36 sps:$4 sm:$0xff]  }
 0x139   :  { %v1772_v25 = vpop.eup %1771 }
 0x13a   :  { %v157_v28 = vadd.f32 1.0, %v1772_v25  ;;  %v158_v29 = vmul.f32 %v156_v24, %v150_v26  ;;  %v1686_v24 = vld [vmem:[#allocation5 + $0x178] ss:$36 sps:$4 sm:$0xff]   ;;  %v1687_v25 = vld [vmem:[#allocation5 + $0x1c0] ss:$36 sps:$4 sm:$0xff]  }
 0x13b   :  { %v1688_v26 = vld [vmem:[#allocation5 + $0x208] ss:$36 sps:$4 sm:$0xff]  }
 0x13c   :  { %v159_v30 = vmul.f32 %v157_v28, %v151_v27  ;;  %v1689_v27 = vld [vmem:[#allocation5 + $0x14] ss:$36 sps:$4 sm:$0xff]  }
 0x13d   :  { %v1691_v28 = vld [vmem:[#allocation5 + $0x18] ss:$36 sps:$4 sm:$0xff]  }
 0x13e   :  { %v160_v31 = vpack.c.bf16 %v159_v30, %v158_v29  ;;  %v1694_v29 = vld [vmem:[#allocation5 + $0x20] ss:$36 sps:$4 sm:$0xff]  }
 0x13f   :  { %v1697_v30 = vld [vmem:[#allocation5 + $0x60] ss:$36 sps:$4 sm:$0xff]  }
 0x140   :  { %1577 = vmatmul.mubr.bf16.vlgmr.msra.gmra.mrb[0].mxu1 %v160_v31  ;;  %v1695_v31 = vld [vmem:[#allocation5 + $0x5c] ss:$36 sps:$4 sm:$0xff]  }
 0x141   :  { %1616 = vmatprep.mubr.msk.bf16.mxu1 %vm1932_vm0, %v1931_v0  ;;  %1601 = vmatpush3.bf16.msra.mxu1 %v1673_v38 }
 0x142   :  { %1602 = vmatprep.subr.bf16.mxu1 %v1931_v0 }
 0x145   :  { %1603 = vmatpush3.bf16.msra.mxu1 %v1674_v39 }
 0x146   :  { %1604 = vmatprep.subr.bf16.mxu1 %v1931_v0 }
 0x149   :  { %1605 = vmatpush3.bf16.msra.mxu1 %v1675_v58  ;;  %v1707_v58 = vld [vmem:[#allocation5 + $0xec] ss:$36 sps:$4 sm:$0xff]  }
 0x14a   :  { %1606 = vmatprep.subr.bf16.mxu1 %v1931_v0 }
 0x14d   :  { %1607 = vmatpush3.bf16.msra.mxu1 %v1676_v59  ;;  %v1710_v59 = vld [vmem:[#allocation5 + $0xf4] ss:$36 sps:$4 sm:$0xff]  }
 0x14e   :  { %1608 = vmatprep.subr.bf16.mxu1 %v1931_v0 }
 0x151   :  { %1609 = vmatpush3.bf16.msra.mxu1 %v1677_v60  ;;  %v1715_v60 = vld [vmem:[#allocation5 + $0x138] ss:$36 sps:$4 sm:$0xff]  }
 0x152   :  { %1610 = vmatprep.subr.bf16.mxu1 %v1931_v0 }
 0x155   :  { %1611 = vmatpush3.bf16.msra.mxu1 %v1678_v61  ;;  %v1718_v61 = vld [vmem:[#allocation5 + $0x140] ss:$36 sps:$4 sm:$0xff]  }
 0x156   :  { %1612 = vmatprep.subr.bf16.mxu1 %v1931_v0 }
 0x159   :  { %1613 = vmatpush3.bf16.msra.mxu1 %v1679_v62  ;;  %v1713_v62 = vld [vmem:[#allocation5 + $0x134] ss:$36 sps:$4 sm:$0xff]  }
 0x15a   :  { %1614 = vmatprep.subr.bf16.mxu1 %v1931_v0 }
 0x15d   :  { %1615 = vmatpush3.bf16.msra.mxu1 %v1680_v63  ;;  %v1716_v63 = vld [vmem:[#allocation5 + $0x13c] ss:$36 sps:$4 sm:$0xff]  }
 0x15e   :  { %867 = vmatprep.subr.bf16.mxu1 %v1691_v28 }
 0x213   :  { %v266_v41 = vpop.f32.mrb[0].mxu1 }
 0x214   :  { %v267_v42 = vadd.f32 %v1368_v40, %v266_v41  ;;  %v1578_v43 = vpop.f32.mrb[1].mxu1 }
 0x215   :  { %v269_v44 = vpop.f32.mrb[2].mxu1 }
 0x216   :  { %v275_v45 = vmul.f32 0.70710677, %v267_v42  ;;  %v270_v46 = vadd.f32 %v1368_v40, %v269_v44  ;;  %v1579_v47 = vpop.f32.mrb[3].mxu1  ;;  %v273_v52 = vmul.f32 0.5, %v267_v42 }
 0x218   :  { %1773 = verf.f32 %v275_v45  ;;  %v276_v48 = vmul.f32 0.70710677, %v270_v46  ;;  %v274_v53 = vmul.f32 0.5, %v270_v46 }
 0x21a   :  { %1775 = verf.f32 %v276_v48  ;;  %v1692_v48 = vld [vmem:[#allocation5 + $0x1c] ss:$36 sps:$4 sm:$0xff]  }
 0x222   :  { %v1774_v49 = vpop.eup %1773 }
 0x223   :  { %v279_v50 = vadd.f32 1.0, %v1774_v49 }
 0x224   :  { %v1776_v51 = vpop.eup %1775 }
 0x225   :  { %v280_v54 = vadd.f32 1.0, %v1776_v51  ;;  %v281_v55 = vmul.f32 %v279_v50, %v273_v52  ;;  %v1700_v50 = vld [vmem:[#allocation5 + $0x68] ss:$36 sps:$4 sm:$0xff]  }
 0x226   :  { %v1698_v51 = vld [vmem:[#allocation5 + $0x64] ss:$36 sps:$4 sm:$0xff]  }
 0x227   :  { %v282_v56 = vmul.f32 %v280_v54, %v274_v53  ;;  %v1703_v52 = vld [vmem:[#allocation5 + $0xa8] ss:$36 sps:$4 sm:$0xff]   ;;  %v1706_v53 = vld [vmem:[#allocation5 + $0xb0] ss:$36 sps:$4 sm:$0xff]  }
 0x228   :  { %v1701_v54 = vld [vmem:[#allocation5 + $0xa4] ss:$36 sps:$4 sm:$0xff]  }
 0x229   :  { %v283_v57 = vpack.c.bf16 %v282_v56, %v281_v55  ;;  %v1704_v55 = vld [vmem:[#allocation5 + $0xac] ss:$36 sps:$4 sm:$0xff]  }
 0x22a   :  { %v1709_v56 = vld [vmem:[#allocation5 + $0xf0] ss:$36 sps:$4 sm:$0xff]  }
 0x22b   :  { %1597 = vmatmul.mubr.bf16.vlgmr.msra.gmra.mrb[4].mxu0 %v283_v57  ;;  %v1712_v57 = vld [vmem:[#allocation5 + $0xf8] ss:$36 sps:$4 sm:$0xff]  }
 0x22c   :  { %1636 = vmatprep.mubr.msk.bf16.mxu0 %vm1932_vm0, %v1931_v0  ;;  %1621 = vmatpush3.bf16.msra.mxu0 %v1681_v1  ;;  %v1721_v1 = vld [vmem:[#allocation5 + $0x180] ss:$36 sps:$4 sm:$0xff]  }
 0x22d   :  { %1622 = vmatprep.subr.bf16.mxu0 %v1931_v0 }
 0x230   :  { %1623 = vmatpush3.bf16.msra.mxu0 %v1682_v2  ;;  %v1724_v2 = vld [vmem:[#allocation5 + $0x188] ss:$36 sps:$4 sm:$0xff]  }
 0x231   :  { %1624 = vmatprep.subr.bf16.mxu0 %v1931_v0 }
 0x234   :  { %1625 = vmatpush3.bf16.msra.mxu0 %v1683_v21 }
 0x235   :  { %1626 = vmatprep.subr.bf16.mxu0 %v1931_v0 }
 0x238   :  { %1627 = vmatpush3.bf16.msra.mxu0 %v1684_v22 }
 0x239   :  { %1628 = vmatprep.subr.bf16.mxu0 %v1931_v0 }
 0x23c   :  { %1629 = vmatpush3.bf16.msra.mxu0 %v1685_v23 }
 0x23d   :  { %1630 = vmatprep.subr.bf16.mxu0 %v1931_v0 }
 0x240   :  { %1631 = vmatpush3.bf16.msra.mxu0 %v1686_v24 }
 0x241   :  { %1632 = vmatprep.subr.bf16.mxu0 %v1931_v0 }
 0x244   :  { %1633 = vmatpush3.bf16.msra.mxu0 %v1687_v25 }
 0x245   :  { %1634 = vmatprep.subr.bf16.mxu0 %v1931_v0 }
 0x248   :  { %1635 = vmatpush3.bf16.msra.mxu0 %v1688_v26 }
 0x249   :  { %910 = vmatprep.subr.bf16.mxu0 %v1694_v29 }
 0x2fe   :  { %v389_v4 = vpop.f32.mrb[4].mxu0 }
 0x2ff   :  { %v390_v5 = vadd.f32 %v1377_v3, %v389_v4  ;;  %v1598_v6 = vpop.f32.mrb[5].mxu0  ;;  %v1722_v4 = vld [vmem:[#allocation5 + $0x184] ss:$36 sps:$4 sm:$0xff]  }
 0x300   :  { %v392_v7 = vpop.f32.mrb[6].mxu0  ;;  %v1730_v6 = vld [vmem:[#allocation5 + $0x1d0] ss:$36 sps:$4 sm:$0xff]  }
 0x301   :  { %v398_v8 = vmul.f32 0.70710677, %v390_v5  ;;  %v393_v9 = vadd.f32 %v1377_v3, %v392_v7  ;;  %v1599_v10 = vpop.f32.mrb[7].mxu0  ;;  %v396_v15 = vmul.f32 0.5, %v390_v5  ;;  %v1719_v3 = vld [vmem:[#allocation5 + $0x17c] ss:$36 sps:$4 sm:$0xff]  }
 0x302   :  { %v1727_v5 = vld [vmem:[#allocation5 + $0x1c8] ss:$36 sps:$4 sm:$0xff]   ;;  %v1736_v10 = vld [vmem:[#allocation5 + $0x218] ss:$36 sps:$4 sm:$0xff]  }
 0x303   :  { %1777 = verf.f32 %v398_v8  ;;  %v399_v11 = vmul.f32 0.70710677, %v393_v9  ;;  %v397_v16 = vmul.f32 0.5, %v393_v9  ;;  %v1725_v7 = vld [vmem:[#allocation5 + $0x1c4] ss:$36 sps:$4 sm:$0xff]  }
 0x304   :  { %v1728_v8 = vld [vmem:[#allocation5 + $0x1cc] ss:$36 sps:$4 sm:$0xff]  }
 0x305   :  { %1779 = verf.f32 %v399_v11  ;;  %v1733_v9 = vld [vmem:[#allocation5 + $0x210] ss:$36 sps:$4 sm:$0xff]  }
 0x306   :  { %v1731_v11 = vld [vmem:[#allocation5 + $0x20c] ss:$36 sps:$4 sm:$0xff]  }
 0x30d   :  { %v1778_v12 = vpop.eup %1777 }
 0x30e   :  { %v402_v13 = vadd.f32 1.0, %v1778_v12  ;;  %v1734_v12 = vld [vmem:[#allocation5 + $0x214] ss:$36 sps:$4 sm:$0xff]  }
 0x30f   :  { %v1780_v14 = vpop.eup %1779 }
 0x310   :  { %v403_v17 = vadd.f32 1.0, %v1780_v14  ;;  %v404_v18 = vmul.f32 %v402_v13, %v396_v15  ;;  %v1933_v13 = vmov 0   ;;  %v1737_v14 = vld [vmem:[#allocation8 + $0x40] sm:$0xff]  }
 0x311   :  { %v1738_v15 = vld [vmem:[#allocation8 + $0xc0] sm:$0xff]  }
 0x312   :  { %v405_v19 = vmul.f32 %v403_v17, %v397_v16  ;;  %v1395_v16 = vld [vmem:[#allocation7 + $0x4] ss:$0 sm:$0xff] }
 0x314   :  { %v406_v20 = vpack.c.bf16 %v405_v19, %v404_v18 }
 0x316   :  { %1617 = vmatmul.mubr.bf16.vlgmr.msra.gmra.mrb[4].mxu1 %v406_v20 }
 0x317   :  { %868 = vmatpush1.bf16.msra.mxu1 %v1689_v27  ;;  %899 = vmatprep.mubr.bf16.mxu1 %v1933_v13 }
 0x318   :  { %869 = vmatprep.subr.bf16.mxu1 %v1697_v30 }
 0x31b   :  { %870 = vmatpush1.bf16.msra.mxu1 %v1695_v31 }
 0x31c   :  { %871 = vmatprep.subr.bf16.mxu1 %v1703_v52  ;;  %v1758_v52 = vld [vmem:[#allocation8 + $0xe8] sm:$0xff]  }
 0x31f   :  { %872 = vmatpush1.bf16.msra.mxu1 %v1701_v54  ;;  %v1760_v54 = vld [vmem:[#allocation8 + $0xa8] sm:$0xff]  }
 0x320   :  { %873 = vmatprep.subr.bf16.mxu1 %v1709_v56  ;;  %v1762_v56 = vld [vmem:[#allocation8 + $0xf0] sm:$0xff]  }
 0x323   :  { %874 = vmatpush1.bf16.msra.mxu1 %v1707_v58  ;;  %v1764_v58 = vld [vmem:[#allocation8 + $0xb0] sm:$0xff]  }
 0x324   :  { %875 = vmatprep.subr.bf16.mxu1 %v1715_v60  ;;  %v1766_v60 = vld [vmem:[#allocation8 + $0xf8] sm:$0xff]  }
 0x327   :  { %876 = vmatpush1.bf16.msra.mxu1 %v1713_v62  ;;  %v1768_v62 = vld [vmem:[#allocation8 + $0xb8] sm:$0xff]  }
 0x328   :  { %877 = vmatprep.subr.bf16.mxu1 %v1721_v1 }
 0x32b   :  { %878 = vmatpush1.bf16.msra.mxu1 %v1719_v3 }
 0x32c   :  { %879 = vmatprep.subr.bf16.mxu1 %v1727_v5 }
 0x32f   :  { %880 = vmatpush1.bf16.msra.mxu1 %v1725_v7 }
 0x330   :  { %881 = vmatprep.subr.bf16.mxu1 %v1733_v9 }
 0x333   :  { %882 = vmatpush1.bf16.msra.mxu1 %v1731_v11 }
 0x334   :  { %1508 = vmatprep.subr.bf16.mxu1 %v1737_v14 }
 0x3e9   :  { %v512_v33 = vpop.f32.mrb[4].mxu1 }
 0x3ea   :  { %v513_v34 = vadd.f32 %v1386_v32, %v512_v33  ;;  %v1618_v35 = vpop.f32.mrb[5].mxu1  ;;  %v1739_v33 = vld [vmem:[#allocation8] sm:$0xff]  }
 0x3eb   :  { %v515_v36 = vpop.f32.mrb[6].mxu1 }
 0x3ec   :  { %v521_v37 = vmul.f32 0.70710677, %v513_v34  ;;  %v516_v38 = vadd.f32 %v1386_v32, %v515_v36  ;;  %v1619_v0 = vpop.f32.mrb[7].mxu1  ;;  %v519_v43 = vmul.f32 0.5, %v513_v34  ;;  %v1740_v34 = vld [vmem:[#allocation8 + $0x80] sm:$0xff]   ;;  %v1741_v36 = vld [vmem:[#allocation8 + $0x48] sm:$0xff]  }
 0x3ed   :  { %v1744_v0 = vld [vmem:[#allocation8 + $0x88] sm:$0xff]  }
 0x3ee   :  { %1781 = verf.f32 %v521_v37  ;;  %v522_v39 = vmul.f32 0.70710677, %v516_v38  ;;  %v520_v44 = vmul.f32 0.5, %v516_v38  ;;  %v1742_v37 = vld [vmem:[#allocation8 + $0xc8] sm:$0xff]  }
 0x3ef   :  { %v1743_v38 = vld [vmem:[#allocation8 + $0x8] sm:$0xff]  }
 0x3f0   :  { %1783 = verf.f32 %v522_v39  ;;  %v1745_v39 = vld [vmem:[#allocation8 + $0x50] sm:$0xff]  }
 0x3f8   :  { %v1782_v40 = vpop.eup %1781 }
 0x3f9   :  { %v525_v41 = vadd.f32 1.0, %v1782_v40  ;;  %v1746_v40 = vld [vmem:[#allocation8 + $0xd0] sm:$0xff]  }
 0x3fa   :  { %v1784_v42 = vpop.eup %1783 }
 0x3fb   :  { %v526_v45 = vadd.f32 1.0, %v1784_v42  ;;  %v527_v46 = vmul.f32 %v525_v41, %v519_v43  ;;  %v1747_v41 = vld [vmem:[#allocation8 + $0x10] sm:$0xff]   ;;  %v1749_v43 = vld [vmem:[#allocation8 + $0x58] sm:$0xff]  }
 0x3fc   :  { %v1748_v42 = vld [vmem:[#allocation8 + $0x90] sm:$0xff]  }
 0x3fd   :  { %v528_v47 = vmul.f32 %v526_v45, %v520_v44  ;;  %v1750_v44 = vld [vmem:[#allocation8 + $0xd8] sm:$0xff]  }
 0x3fe   :  { %v1751_v45 = vld [vmem:[#allocation8 + $0x18] sm:$0xff]  }
 0x3ff   :  { %v529_v49 = vpack.c.bf16 %v528_v47, %v527_v46  ;;  %v1752_v46 = vld [vmem:[#allocation8 + $0x98] sm:$0xff]   ;;  %v1753_v47 = vld [vmem:[#allocation8 + $0x60] sm:$0xff]  }
 0x401   :  { %1637 = vmatmul.mubr.bf16.vlgmr.msra.gmra.mrb[8].mxu0 %v529_v49  ;;  %v1755_v49 = vld [vmem:[#allocation8 + $0x20] sm:$0xff]  }
 0x402   :  { %911 = vmatpush1.bf16.msra.mxu0 %v1692_v48  ;;  %942 = vmatprep.mubr.bf16.mxu0 %v1933_v13  ;;  %v1754_v48 = vld [vmem:[#allocation8 + $0xe0] sm:$0xff]  }
 0x403   :  { %912 = vmatprep.subr.bf16.mxu0 %v1700_v50  ;;  %v1756_v50 = vld [vmem:[#allocation8 + $0xa0] sm:$0xff]  }
 0x406   :  { %913 = vmatpush1.bf16.msra.mxu0 %v1698_v51  ;;  %v1757_v51 = vld [vmem:[#allocation8 + $0x68] sm:$0xff]  }
 0x407   :  { %914 = vmatprep.subr.bf16.mxu0 %v1706_v53  ;;  %v1759_v53 = vld [vmem:[#allocation8 + $0x28] sm:$0xff]  }
 0x40a   :  { %915 = vmatpush1.bf16.msra.mxu0 %v1704_v55  ;;  %v1761_v55 = vld [vmem:[#allocation8 + $0x70] sm:$0xff]  }
 0x40b   :  { %916 = vmatprep.subr.bf16.mxu0 %v1712_v57  ;;  %v1763_v57 = vld [vmem:[#allocation8 + $0x30] sm:$0xff]  }
 0x40e   :  { %917 = vmatpush1.bf16.msra.mxu0 %v1710_v59  ;;  %v1765_v59 = vld [vmem:[#allocation8 + $0x78] sm:$0xff]  }
 0x40f   :  { %918 = vmatprep.subr.bf16.mxu0 %v1718_v61  ;;  %v1767_v61 = vld [vmem:[#allocation8 + $0x38] sm:$0xff]  }
 0x412   :  { %919 = vmatpush1.bf16.msra.mxu0 %v1716_v63  ;;  %v687_v63 = vlaneseq }
 0x413   :  { %920 = vmatprep.subr.bf16.mxu0 %v1724_v2 }
 0x414   :  { %v688_v1 = vshrl.u32 %v687_v63, 7 }
 0x416   :  { %921 = vmatpush1.bf16.msra.mxu0 %v1722_v4  ;;  %v689_v2 = vsub.s32 0, %v688_v1  ;;  %v697_v3 = vsub.s32 2, %v688_v1  ;;  %v685_v4 = vld [vmem:[#allocation7 + $0x5] sm:$0xf]  ;;  %v693_v5 = vsub.s32 1, %v688_v1 }
 0x417   :  { %922 = vmatprep.subr.bf16.mxu0 %v1730_v6  ;;  %v701_v6 = vsub.s32 3, %v688_v1 }
 0x418   :  { %v690_v7 = vrot.slane %v685_v4, %v689_v2  ;;  %v694_v9 = vrot.slane %v685_v4, %v693_v5 }
 0x41a   :  { %923 = vmatpush1.bf16.msra.mxu0 %v1728_v8  ;;  %v698_v8 = vrot.slane %v685_v4, %v697_v3 }
 0x41b   :  { %924 = vmatprep.subr.bf16.mxu0 %v1736_v10  ;;  %v702_v10 = vrot.slane %v685_v4, %v701_v6 }
 0x41e   :  { %925 = vmatpush1.bf16.msra.mxu0 %v1734_v12 }
 0x41f   :  { %1530 = vmatprep.subr.bf16.mxu0 %v1738_v15 }
 0x4d4   :  { %v635_v17 = vpop.f32.mrb[8].mxu0 }
 0x4d5   :  { %v636_v18 = vadd.f32 %v1395_v16, %v635_v17  ;;  %v1638_v19 = vpop.f32.mrb[9].mxu0 }
 0x4d6   :  { %v638_v20 = vpop.f32.mrb[10].mxu0 }
 0x4d7   :  { %v644_v21 = vmul.f32 0.70710677, %v636_v18  ;;  %v639_v22 = vadd.f32 %v1395_v16, %v638_v20  ;;  %v1639_v23 = vpop.f32.mrb[11].mxu0  ;;  %v642_v28 = vmul.f32 0.5, %v636_v18 }
 0x4d9   :  { %1785 = verf.f32 %v644_v21  ;;  %v645_v24 = vmul.f32 0.70710677, %v639_v22  ;;  %v643_v29 = vmul.f32 0.5, %v639_v22 }
 0x4db   :  { %1787 = verf.f32 %v645_v24 }
 0x4e3   :  { %v1786_v25 = vpop.eup %1785 }
 0x4e4   :  { %v648_v26 = vadd.f32 1.0, %v1786_v25 }
 0x4e5   :  { %v1788_v27 = vpop.eup %1787 }
 0x4e6   :  { %v649_v30 = vadd.f32 1.0, %v1788_v27  ;;  %v650_v31 = vmul.f32 %v648_v26, %v642_v28 }
 0x4e8   :  { %v651_v32 = vmul.f32 %v649_v30, %v643_v29 }
 0x4ea   :  { %v652_v35 = vpack.c.bf16 %v651_v32, %v650_v31 }
 0x4ec   :  { %900 = vmatmul.mubr.bf16.vlgmr.msra.gmra.mrb[8].mxu1 %v652_v35  ;;  %943 = vmatmul.mubr.bf16.vlgmr.msra.gmra.mrb[12].mxu0 %v652_v35 }
 0x4ed   :  { %1509 = vmatpush3.bf16.msra.mxu1 %v1739_v33  ;;  %1531 = vmatpush3.bf16.msra.mxu0 %v1740_v34 }
 0x4ee   :  { %1510 = vmatprep.subr.bf16.mxu1 %v1741_v36  ;;  %1532 = vmatprep.subr.bf16.mxu0 %v1742_v37 }
 0x4f1   :  { %1511 = vmatpush3.bf16.msra.mxu1 %v1743_v38  ;;  %1533 = vmatpush3.bf16.msra.mxu0 %v1744_v0 }
 0x4f2   :  { %1512 = vmatprep.subr.bf16.mxu1 %v1745_v39  ;;  %1534 = vmatprep.subr.bf16.mxu0 %v1746_v40 }
 0x4f5   :  { %1513 = vmatpush3.bf16.msra.mxu1 %v1747_v41  ;;  %1535 = vmatpush3.bf16.msra.mxu0 %v1748_v42 }
 0x4f6   :  { %1514 = vmatprep.subr.bf16.mxu1 %v1749_v43  ;;  %1536 = vmatprep.subr.bf16.mxu0 %v1750_v44 }
 0x4f9   :  { %1515 = vmatpush3.bf16.msra.mxu1 %v1751_v45  ;;  %1537 = vmatpush3.bf16.msra.mxu0 %v1752_v46 }
 0x4fa   :  { %1516 = vmatprep.subr.bf16.mxu1 %v1753_v47  ;;  %1538 = vmatprep.subr.bf16.mxu0 %v1754_v48 }
 0x4fd   :  { %1517 = vmatpush3.bf16.msra.mxu1 %v1755_v49  ;;  %1539 = vmatpush3.bf16.msra.mxu0 %v1756_v50 }
 0x4fe   :  { %1518 = vmatprep.subr.bf16.mxu1 %v1757_v51  ;;  %1540 = vmatprep.subr.bf16.mxu0 %v1758_v52 }
 0x501   :  { %1519 = vmatpush3.bf16.msra.mxu1 %v1759_v53  ;;  %1541 = vmatpush3.bf16.msra.mxu0 %v1760_v54 }
 0x502   :  { %1520 = vmatprep.subr.bf16.mxu1 %v1761_v55  ;;  %1542 = vmatprep.subr.bf16.mxu0 %v1762_v56 }
 0x505   :  { %1521 = vmatpush3.bf16.msra.mxu1 %v1763_v57  ;;  %1543 = vmatpush3.bf16.msra.mxu0 %v1764_v58 }
 0x506   :  { %1522 = vmatprep.subr.bf16.mxu1 %v1765_v59  ;;  %1544 = vmatprep.subr.bf16.mxu0 %v1766_v60 }
 0x509   :  { %1523 = vmatpush3.bf16.msra.mxu1 %v1767_v61  ;;  %1545 = vmatpush3.bf16.msra.mxu0 %v1768_v62 }
 0x5bf   :  { %v901_v11 = vpop.f32.mrb[8].mxu1  ;;  %v944_v12 = vpop.f32.mrb[12].mxu0 }
 0x5c0   :  { %v902_v13 = vadd.f32 %v901_v11, %v690_v7  ;;  %v945_v14 = vadd.f32 %v944_v12, %v698_v8  ;;  %v903_v15 = vpop.f32.mrb[9].mxu1  ;;  %v946_v16 = vpop.f32.mrb[13].mxu0 }
 0x5c1   :  { %v904_v17 = vadd.f32 %v903_v15, %v694_v9  ;;  %v947_v18 = vadd.f32 %v946_v16, %v702_v10  ;;  %v905_v19 = vpop.f32.mrb[10].mxu1  ;;  %v948_v20 = vpop.f32.mrb[14].mxu0 }
 0x5c2   :  { %v961_v21 = vmul.f32 0.70710677, %v902_v13  ;;  %v963_v22 = vmul.f32 0.70710677, %v945_v14  ;;  %v906_v25 = vadd.f32 %v905_v19, %v690_v7  ;;  %v949_v26 = vadd.f32 %v948_v20, %v698_v8  ;;  %v907_v27 = vpop.f32.mrb[11].mxu1  ;;  %v950_v28 = vpop.f32.mrb[15].mxu0 }
 0x5c3   :  { %v962_v23 = vmul.f32 0.70710677, %v904_v17  ;;  %v964_v24 = vmul.f32 0.70710677, %v947_v18  ;;  %v908_v29 = vadd.f32 %v907_v27, %v694_v9  ;;  %v951_v30 = vadd.f32 %v950_v28, %v702_v10  ;;  %v1436_v9 = vld [vmem:[%s2091_s4] ss:$0 sm:$0xff] }
 0x5c4   :  { %1789 = verf.f32 %v961_v21  ;;  %v965_v31 = vmul.f32 0.70710677, %v906_v25  ;;  %v967_v32 = vmul.f32 0.70710677, %v949_v26  ;;  %v953_v40 = vmul.f32 0.5, %v902_v13  ;;  %s1893_s4 = scalar_lea.vmem %s1350_s19, 256 }
 0x5c5   :  { %1791 = verf.f32 %v963_v22  ;;  %v966_v33 = vmul.f32 0.70710677, %v908_v29  ;;  %v968_v34 = vmul.f32 0.70710677, %v951_v30  ;;  %v955_v41 = vmul.f32 0.5, %v945_v14  ;;  %p1894_p4 = scmp.ne.s32.totalorder %s1350_s19, %s1893_s4  ;;  %p1899_p6 = scmp.lt.s32.totalorder %s1893_s4, %s1893_s4 }
 0x5c6   :  { %1793 = verf.f32 %v962_v23  ;;  %v954_v44 = vmul.f32 0.5, %v904_v17  ;;  %v957_v46 = vmul.f32 0.5, %v906_v25  ;;  %v956_v49 = vmul.f32 0.5, %v947_v18 }
 0x5c7   :  { %1795 = verf.f32 %v964_v24  ;;  %v959_v51 = vmul.f32 0.5, %v949_v26  ;;  %v958_v56 = vmul.f32 0.5, %v908_v29  ;;  %v960_v60 = vmul.f32 0.5, %v951_v30  ;;  %p1900_p7 = por %p1899_p6, %p1898_p5 }
 0x5c8   :  { %1797 = verf.f32 %v965_v31 }
 0x5c9   :  { %1799 = verf.f32 %v967_v32  ;;  %p1901_p8 = pnand %p1900_p7, %p1894_p4 }
 0x5ca   :  { %1801 = verf.f32 %v966_v33 }
 0x5cb   :  { %1803 = verf.f32 %v968_v34 }
 0x5ce   :  { %v1790_v35 = vpop.eup %1789 }
 0x5cf   :  { %v1792_v36 = vpop.eup %1791  ;;  %v977_v0 = vadd.f32 1.0, %v1790_v35 }
 0x5d0   :  { %v1794_v37 = vpop.eup %1793  ;;  %v979_v42 = vadd.f32 1.0, %v1792_v36 }
 0x5d1   :  { %v1796_v38 = vpop.eup %1795  ;;  %v978_v45 = vadd.f32 1.0, %v1794_v37  ;;  %v985_v54 = vmul.f32 %v977_v0, %v953_v40 }
 0x5d2   :  { %v1798_v39 = vpop.eup %1797  ;;  %v980_v50 = vadd.f32 1.0, %v1796_v38  ;;  %v987_v58 = vmul.f32 %v979_v42, %v955_v41 }
 0x5d3   :  { %v1800_v43 = vpop.eup %1799  ;;  %v981_v47 = vadd.f32 1.0, %v1798_v39  ;;  %v986_v62 = vmul.f32 %v978_v45, %v954_v44 }
 0x5d4   :  { %v1802_v48 = vpop.eup %1801  ;;  %v983_v52 = vadd.f32 1.0, %v1800_v43  ;;  %v988_v2 = vmul.f32 %v980_v50, %v956_v49 }
 0x5d5   :  { %v1804_v53 = vpop.eup %1803  ;;  %v989_v55 = vmul.f32 %v981_v47, %v957_v46  ;;  %v982_v57 = vadd.f32 1.0, %v1802_v48 }
 0x5d6   :  { %v991_v59 = vmul.f32 %v983_v52, %v959_v51  ;;  %v984_v61 = vadd.f32 1.0, %v1804_v53 }
 0x5d7   :  { %v993_v63 = vpack.c.bf16 %v989_v55, %v985_v54  ;;  %v990_v1 = vmul.f32 %v982_v57, %v958_v56 }
 0x5d8   :  { %v995_v3 = vpack.c.bf16 %v991_v59, %v987_v58  ;;  %v992_v4 = vmul.f32 %v984_v61, %v960_v60 }
 0x5d9   :  { %v994_v5 = vpack.c.bf16 %v990_v1, %v986_v62 }
 0x5da   :  { %v996_v6 = vpack.c.bf16 %v992_v4, %v988_v2 }
 0x5db   :  { %1292 = vmatprep.mubr.bf16.mxu1 %v994_v5 }
 0x5dc   :  { %1333 = vmatprep.mubr.bf16.mxu0 %v996_v6  ;;  %1293 = vmatmul.mubr.bf16.vlgmr.msra.gmra.mrb[12].mxu1 %v993_v63 }
 0x5dd   :  { %1334 = vmatmul.mubr.bf16.vlgmr.msra.gmra.mrb[16].mxu0 %v995_v3 }
 0x6af   :  { %v1524_v7 = vpop.f32.mrb[12].mxu1 }
 0x6b0   :  { %v1546_v8 = vpop.f32.mrb[16].mxu0  ;;  %v1525_v10 = vpop.f32.mrb[13].mxu1 }
 0x6b1   :  { %v1526_v11 = vadd.f32 %v1525_v10, %v1524_v7  ;;  %v1547_v12 = vpop.f32.mrb[17].mxu0  ;;  %v1527_v13 = vpop.f32.mrb[14].mxu1 }
 0x6b2   :  { %v1548_v14 = vadd.f32 %v1547_v12, %v1546_v8  ;;  %v1549_v15 = vpop.f32.mrb[18].mxu0  ;;  %v1528_v16 = vpop.f32.mrb[15].mxu1 }
 0x6b3   :  { %v1295_v17 = vadd.f32 %v1526_v11, %v1436_v9  ;;  %v1529_v18 = vadd.f32 %v1528_v16, %v1527_v13  ;;  %v1550_v19 = vpop.f32.mrb[19].mxu0 }
 0x6b4   :  { %v1551_v20 = vadd.f32 %v1550_v19, %v1549_v15 }
 0x6b5   :  { %v1336_v21 = vadd.f32 %v1548_v14, %v1295_v17  ;;  %v1298_v22 = vadd.f32 %v1529_v18, %v1436_v9 }
 0x6b7   :  { %1342 = vst [vmem:[#allocation10] sm:$0xff] %v1336_v21  ;;  %v1339_v23 = vadd.f32 %v1551_v20, %v1298_v22 }
 0x6b9   :  { %1343 = vst [vmem:[#allocation10 + $0x8] sm:$0xff] %v1339_v23 }
 0x6ba   :  { %1904 = shalt.err (!%p1901_p8)
}
 0x6bb   :  { %s1905_s22 = scalar_lea.hbm %s2092_s5, 256 }
 0x6bc   :  { %p1906_p9 = scmp.ne.s32.totalorder %s2092_s5, %s1905_s22  ;;  %p1909_p10 = scmp.lt.u32.totalorder %s1905_s22, %s2092_s5 }
 0x6be   :  { %p1911_p11 = pnand %p1909_p10, %p1906_p9 }
 0x6c0   :  { %1914 = shalt.err (!%p1911_p11)
}
 0x6c1   :  { %s1935_s27 = smov 128   ;;  %s1936_s28 = smov 8  }
 0x6c2   :  { %1355 = dma.vmem_to_hbm [thread:$0]  %s1350_s19, 256, %s2092_s5, [#allocation4], %s1935_s27, %s1935_s27, %s1936_s28  }
 0x6c3   :  { %1921 = dma.done.wait [#allocation4], 256  }
 0x6c4   :  { %1922 = vsyncadd [#allocation4], 4294967040 }
 0x6c5   :  { %1359 = vsyncpa [#allocation3], 1 }
 0x6c6   :  { %1360 = vsyncpa [#allocation6], 1 }
 0x6c7   :  { %1361 = vsyncpa [#allocation9], 1 }
 0x6c8   :  { %1362 = vsyncpa [#allocation4], 1 }

</bundles_post_ra>
